<compile_context>
chip_gen: v6e
topology: v6e:2x2x1
jax: 0.10.0
libtpu: 0.0.40
codegen_flags: <defaults>
</compile_context>

<pallas_src>
import jax
import jax.numpy as jnp
from jax.experimental import pallas as pl
from jax.experimental.pallas import tpu as pltpu


def _round_up(x, m):
    return ((x + m - 1) // m) * m


def _generator_kernel(x_ref, w1_ref, b1_ref, w2_ref, b2_ref, o_ref):
    # Layer 1: Linear(z_dim -> hidden), bf16 operands, f32 accumulate on MXU.
    h = jnp.dot(x_ref[...], w1_ref[...], preferred_element_type=jnp.float32)
    h = h + b1_ref[...]                      # broadcast [1, hidden] over batch (f32)
    # LeakyReLU(negative_slope=0.1): single VPU max (slope < 1).
    h = jnp.maximum(h, 0.1 * h)
    # Layer 2: Linear(hidden -> img_dim), bf16 operands, f32 accumulate.
    y = jnp.dot(h.astype(jnp.bfloat16), w2_ref[...],
                preferred_element_type=jnp.float32)
    y = y + b2_ref[...]
    # Tanh epilogue in f32, lane-dense f32 store.
    o_ref[...] = jnp.tanh(y).astype(o_ref.dtype)


def generator_forward(x, w1, b1, w2, b2, *, tile_b=256):
    """x: [B, z_dim] f32; weights [in, out]; biases [1, out]. Returns [B, img_dim] f32."""
    B, z_dim = x.shape
    hidden = w1.shape[1]
    img_dim = w2.shape[1]

    # Tile the batch; pad (with zeros) to a multiple of the tile if necessary.
    tile_b = min(tile_b, _round_up(B, 8))
    B_pad = _round_up(B, tile_b)

    # bf16 matmul operands (halves x/W DMA bytes); biases stay f32 for epilogue.
    x_bf = x.astype(jnp.bfloat16)
    if B_pad != B:
        x_bf = jnp.pad(x_bf, ((0, B_pad - B), (0, 0)))
    w1_bf = w1.astype(jnp.bfloat16)
    w2_bf = w2.astype(jnp.bfloat16)

    grid = (B_pad // tile_b,)

    flops = 2 * B_pad * z_dim * hidden + 2 * B_pad * hidden * img_dim
    transcendentals = B_pad * img_dim  # tanh
    bytes_accessed = (
        x_bf.size * 2 + w1_bf.size * 2 + w2_bf.size * 2
        + b1.size * 4 + b2.size * 4 + B_pad * img_dim * 4
    )

    out = pl.pallas_call(
        _generator_kernel,
        out_shape=jax.ShapeDtypeStruct((B_pad, img_dim), x.dtype),
        grid_spec=pl.GridSpec(
            grid=grid,
            in_specs=[
                # batch-tiled activations: pipelined across grid steps
                pl.BlockSpec((tile_b, z_dim), lambda i: (i, 0)),
                # weights/biases: constant index_map -> DMA once, stay resident
                pl.BlockSpec((z_dim, hidden), lambda i: (0, 0)),
                pl.BlockSpec((1, hidden), lambda i: (0, 0)),
                pl.BlockSpec((hidden, img_dim), lambda i: (0, 0)),
                pl.BlockSpec((1, img_dim), lambda i: (0, 0)),
            ],
            out_specs=pl.BlockSpec((tile_b, img_dim), lambda i: (i, 0)),
        ),
        compiler_params=pltpu.CompilerParams(
            dimension_semantics=("parallel",),  # shard batch across TCs on v7x
        ),
        cost_estimate=pl.CostEstimate(
            flops=flops,
            transcendentals=transcendentals,
            bytes_accessed=bytes_accessed,
        ),
    )(x_bf, w1_bf, b1, w2_bf, b2)

    return out[:B]


def init_generator_params(key, z_dim, hidden, img_dim):
    """Deterministic init mimicking PyTorch nn.Linear default:
    uniform(-1/sqrt(fan_in), 1/sqrt(fan_in))."""
    k1, k2, k3, k4 = jax.random.split(key, 4)
    bound1 = 1.0 / jnp.sqrt(z_dim)
    bound2 = 1.0 / jnp.sqrt(hidden)
    # stored as [in, out] (transposed vs PyTorch's [out, in])
    w1 = jax.random.uniform(k1, (z_dim, hidden), jnp.float32, -bound1, bound1)
    b1 = jax.random.uniform(k2, (1, hidden), jnp.float32, -bound1, bound1)
    w2 = jax.random.uniform(k3, (hidden, img_dim), jnp.float32, -bound2, bound2)
    b2 = jax.random.uniform(k4, (1, img_dim), jnp.float32, -bound2, bound2)
    return w1, b1, w2, b2


def _reference_forward(x, w1, b1, w2, b2):
    h = x @ w1 + b1
    h = jnp.where(h >= 0, h, 0.1 * h)
    return jnp.tanh(h @ w2 + b2)


if __name__ == "__main__":
    z_dim = 64
    hidden = 256
    img_dim = 256   # synthetic flattened image size, lane-aligned (multiple of 128)
    batch = 512     # >= 256 so the MXU M dimension is full and the grid pipelines

    key = jax.random.PRNGKey(0)
    kx, kp = jax.random.split(key)
    x = jax.random.normal(kx, (batch, z_dim), dtype=jnp.float32)
    w1, b1, w2, b2 = init_generator_params(kp, z_dim, hidden, img_dim)

    out = generator_forward(x, w1, b1, w2, b2, tile_b=256)
    out = jax.block_until_ready(out)

    ref = _reference_forward(x, w1, b1, w2, b2)
    assert out.shape == (batch, img_dim)
    # bf16 matmul operands with f32 accumulation -> loosen tolerance vs f32 ref.
    assert jnp.allclose(out, ref, atol=2e-2, rtol=2e-2), float(
        jnp.max(jnp.abs(out - ref))
    )

    print("KERNEL_OK")
</pallas_src>

<mosaic_0001>
module attributes {stable_mosaic.version = 11 : i64} {
  func.func @_generator_kernel(%arg0: i32, %arg1: memref<256x64xbf16, #tpu.memory_space<vmem>>, %arg2: memref<64x256xbf16, #tpu.memory_space<vmem>>, %arg3: memref<1x256xf32, #tpu.memory_space<vmem>>, %arg4: memref<256x256xbf16, #tpu.memory_space<vmem>>, %arg5: memref<1x256xf32, #tpu.memory_space<vmem>>, %arg6: memref<256x256xf32, #tpu.memory_space<vmem>>) attributes {dimension_semantics = [#tpu.dimension_semantics<parallel>], iteration_bounds = array<i64: 2>, scalar_prefetch = 0 : i64, scratch_operands = 0 : i64, tpu.core_type = #tpu.core_type<tc>, window_params = [{transform_indices = @transform_0, window_bounds = array<i64: 256, 64>}, {pipeline_mode = #tpu.pipeline_mode<synchronous>, transform_indices = @transform_1, window_bounds = array<i64: 64, 256>}, {pipeline_mode = #tpu.pipeline_mode<synchronous>, transform_indices = @transform_2, window_bounds = array<i64: 1, 256>}, {pipeline_mode = #tpu.pipeline_mode<synchronous>, transform_indices = @transform_3, window_bounds = array<i64: 256, 256>}, {pipeline_mode = #tpu.pipeline_mode<synchronous>, transform_indices = @transform_4, window_bounds = array<i64: 1, 256>}, {transform_indices = @transform_5, window_bounds = array<i64: 256, 256>}]} {
    %c0 = arith.constant 0 : index
    %c0_0 = arith.constant 0 : index
    %0 = vector.load %arg1[%c0, %c0_0] : memref<256x64xbf16, #tpu.memory_space<vmem>>, vector<256x64xbf16>
    %c0_1 = arith.constant 0 : index
    %c0_2 = arith.constant 0 : index
    %1 = vector.load %arg2[%c0_1, %c0_2] : memref<64x256xbf16, #tpu.memory_space<vmem>>, vector<64x256xbf16>
    %cst = arith.constant dense<0.000000e+00> : vector<256x256xf32>
    %2 = tpu.matmul %0, %1, %cst {dimension_numbers = #tpu.dot_dimension_numbers<[1], [0], [0], [1], [0, 0, 1, 1], [], []>} : vector<256x64xbf16>, vector<64x256xbf16>, vector<256x256xf32> -> vector<256x256xf32>
    %c0_3 = arith.constant 0 : index
    %c0_4 = arith.constant 0 : index
    %3 = vector.load %arg3[%c0_3, %c0_4] : memref<1x256xf32, #tpu.memory_space<vmem>>, vector<1x256xf32>
    %4 = vector.broadcast %3 : vector<1x256xf32> to vector<256x256xf32>
    %5 = arith.addf %2, %4 : vector<256x256xf32>
    %cst_5 = arith.constant 1.000000e-01 : f32
    %6 = vector.broadcast %cst_5 : f32 to vector<256x256xf32>
    %7 = arith.mulf %6, %5 : vector<256x256xf32>
    %8 = arith.maximumf %5, %7 : vector<256x256xf32>
    %9 = arith.truncf %8 : vector<256x256xf32> to vector<256x256xbf16>
    %c0_6 = arith.constant 0 : index
    %c0_7 = arith.constant 0 : index
    %10 = vector.load %arg4[%c0_6, %c0_7] : memref<256x256xbf16, #tpu.memory_space<vmem>>, vector<256x256xbf16>
    %cst_8 = arith.constant dense<0.000000e+00> : vector<256x256xf32>
    %11 = tpu.matmul %9, %10, %cst_8 {dimension_numbers = #tpu.dot_dimension_numbers<[1], [0], [0], [1], [0, 0, 1, 1], [], []>} : vector<256x256xbf16>, vector<256x256xbf16>, vector<256x256xf32> -> vector<256x256xf32>
    %c0_9 = arith.constant 0 : index
    %c0_10 = arith.constant 0 : index
    %12 = vector.load %arg5[%c0_9, %c0_10] : memref<1x256xf32, #tpu.memory_space<vmem>>, vector<1x256xf32>
    %13 = vector.broadcast %12 : vector<1x256xf32> to vector<256x256xf32>
    %14 = arith.addf %11, %13 : vector<256x256xf32>
    %15 = math.tanh %14 : vector<256x256xf32>
    %c0_11 = arith.constant 0 : index
    %c0_12 = arith.constant 0 : index
    %16 = vector.load %arg6[%c0_11, %c0_12] : memref<256x256xf32, #tpu.memory_space<vmem>>, vector<256x256xf32>
    tpu.vector_store %arg6[%c0_11, %c0_12], %15 {strides = array<i32>} : memref<256x256xf32, #tpu.memory_space<vmem>>, vector<256x256xf32>,
    return
  }
  func.func @transform_0(%arg0: i32) -> (i32, i32) {
    %c0_i32 = arith.constant 0 : i32
    %c0_i32_0 = arith.constant 0 : i32
    return %arg0, %c0_i32 : i32, i32
  }
  func.func @transform_1(%arg0: i32) -> (i32, i32) {
    %c0_i32 = arith.constant 0 : i32
    %c0_i32_0 = arith.constant 0 : i32
    %c0_i32_1 = arith.constant 0 : i32
    return %c0_i32, %c0_i32_0 : i32, i32
  }
  func.func @transform_2(%arg0: i32) -> (i32, i32) {
    %c0_i32 = arith.constant 0 : i32
    %c0_i32_0 = arith.constant 0 : i32
    %c0_i32_1 = arith.constant 0 : i32
    return %c0_i32, %c0_i32_0 : i32, i32
  }
  func.func @transform_3(%arg0: i32) -> (i32, i32) {
    %c0_i32 = arith.constant 0 : i32
    %c0_i32_0 = arith.constant 0 : i32
    %c0_i32_1 = arith.constant 0 : i32
    return %c0_i32, %c0_i32_0 : i32, i32
  }
  func.func @transform_4(%arg0: i32) -> (i32, i32) {
    %c0_i32 = arith.constant 0 : i32
    %c0_i32_0 = arith.constant 0 : i32
    %c0_i32_1 = arith.constant 0 : i32
    return %c0_i32, %c0_i32_0 : i32, i32
  }
  func.func @transform_5(%arg0: i32) -> (i32, i32) {
    %c0_i32 = arith.constant 0 : i32
    %c0_i32_0 = arith.constant 0 : i32
    return %arg0, %c0_i32 : i32, i32
  }
}

</mosaic_0001>

<bundles_post_ra>
// kernel: tpu_custom_call.1
= control target key start
LH: loop header
LB: loop body
LE: loop exit
PB: predicated region body
PF: predicated region fallthrough
CT: control target
= control target key end

     0   :  { %10 = vsyncpa [#allocation3], 0  ;;  %s2360_s0 = inlined_call_operand.vmem [shape: bf16[512,64], index: 0, kind: input, shape index: {}]   ;;  %s2361_s1 = inlined_call_operand.vmem [shape: bf16[64,256], index: 1, kind: input, shape index: {}]   ;;  %s2362_s2 = inlined_call_operand.vmem [shape: f32[1,256], index: 2, kind: input, shape index: {}]   ;;  %s2363_s3 = inlined_call_operand.vmem [shape: bf16[256,256], index: 3, kind: input, shape index: {}]   ;;  %s2364_s4 = inlined_call_operand.vmem [shape: f32[1,256], index: 4, kind: input, shape index: {}]   ;;  %s2365_s5 = inlined_call_operand.hbm [shape: f32[512,256], index: 5, kind: output, shape index: {}]  }
   0x1   :  { %12 = vsyncpa [#allocation3 + $0x1], 0  ;;  %s1864_s18 = smov 0   ;;  %s1866_s19 = smov 0  }
   0x2   :  { %s1868_s20 = smov 0   ;;  %s1870_s21 = smov 0  }
   0x3 LB: > { %s1885_s22 = sadd.s32 4294967295, %s1828_s21   ;;  %s1403_s23 = sadd.s32 4294967294, %s1828_s21   ;;  %s1828_s21 = sphi %s1870_s21, %s2371_s21   ;;  %s1824_s20 = sphi %s1868_s20, %s2370_s20   ;;  %s1820_s19 = sphi %s1866_s19, %s2369_s19   ;;  %s1816_s18 = sphi %s1864_s18, %s2368_s18  }
   0x4   : > { %s1889_s24 = sadd.s32 1, %s1828_s21   ;;  %s135_s25 = sadd.s32 1, %s1824_s20 }
   0x5   : > { %s132_s26 = ssub.s32 %s1828_s21, %s1889_s24  ;;  %p145_p0 = scmp.ne.s32.totalorder %s1824_s20, %s1820_s19 }
   0x6   : > { %p133_p1 = scmp.eq.s32.totalorder %s132_s26, 0  ;;  %p146_p2 = scmp.eq.s32.totalorder %s1885_s22, 1 }
   0x7   : > { %p151_p3 = scmp.ne.s32.totalorder %s1820_s19, %s1816_s18  ;;  %p152_p4 = scmp.eq.s32.totalorder %s1403_s23, 1 }
   0x8   : > { %s1900_s27 = scalar_select %p133_p1, %s1824_s20, %s135_s25  }
   0x9   : > { %p1902_p5 = por %p146_p2, %p145_p0  ;;  %p1906_p6 = por %p152_p4, %p151_p3 }
   0xa   : > { %p1406_p7 = scmp.ge.s32.totalorder %s1828_s21, 1  ;;  %p191_p8 = scmp.lt.s32.totalorder %s1828_s21, 3 }
   0xc   : > { %p192_p9 = pnand %p1406_p7, %p191_p8 }
   0xd   : > { %s1408_s7 = sshll.u32 (!%p192_p9), %s1885_s22, 5  ;;  %s216_s17 = sand.u32 (!%p192_p9), 1, %s1820_s19  }
   0xe   : > { %195 = sbr.rel (%p192_p9) target bundleno = 593 (0x251), region = 40  ;;  %p220_p10 = scmp.lt.s32.totalorder (!%p192_p9), %s1408_s7, 63 }
   0xf   : > { %s1407_s23 = sshll.u32 (!%p192_p9), %s216_s17, 9  ;;  %s1489_s30 = sshll.u32 (!%p192_p9), %s1885_s22, 13 }
  0x10   : > { %s2187_s26 = scalar_lea.vmem (!%p192_p9), [#allocation2], %s1407_s23  ;;  %s2320_s10 = scalar_lea.sflag (!%p192_p9), [#allocation3], %s216_s17 }
  0x11   : > { %s1341_s6 = sshll.u32 (!%p192_p9), %s2187_s26, 4  ;;  %s1831_s11 = smov (!%p192_p9), [#allocation2]   ;;  %s2314_s6 = int_to_ptr.vmem [resolvable:$true] %s1341_s6 }
  0x12   : > { %s1768_s22 = scalar_lea.vmem (!%p192_p9), %s2314_s6, 8192  ;;  %s1772_s12 = sshll.u32 (!%p192_p9), %s1831_s11, 4  ;;  %s1773_s12 = int_to_ptr.vmem [resolvable:$false] %s1772_s12 }
  0x13   : > { %v1564_v0 = vld [vmem:[%s2361_s1 + $0x34] ss:$8 sps:$4 sm:$0xff]   ;;  %v1566_v1 = vld [vmem:[%s2361_s1 + $0x30] ss:$8 sps:$4 sm:$0xff]   ;;  %v1830_v2 = vmov 0   ;;  %s2373_s7 = smov (!%p220_p10, %s1408_s7), 63  ;;  %v269_v57 = vlaneseq  ;;  %p1769_p11 = scmp.ne.s32.totalorder %s2314_s6, %s1768_s22 }
  0x14   : > { %480 = vmatprep.mubr.bf16.mxu0 %v1830_v2  ;;  %456 = vmatprep.subr.bf16.mxu0 %v1564_v0  ;;  %v1567_v3 = vld [vmem:[%s2361_s1 + $0x24] ss:$8 sps:$4 sm:$0xff]   ;;  %v1569_v4 = vld [vmem:[%s2361_s1 + $0x20] ss:$8 sps:$4 sm:$0xff]   ;;  %v1570_v5 = vld [vmem:[%s2361_s1 + $0x14] ss:$8 sps:$4 sm:$0xff]   ;;  %p1775_p0 = scmp.lt.s32.totalorder %s2314_s6, %s1773_s12 }
  0x15   : > { %457 = vmatpush1.bf16.msra.mxu0 %v1566_v1  ;;  %s1409_s16 = sshll.u32 %s2373_s7, 2  ;;  %v1572_v6 = vld [vmem:[%s2361_s1 + $0x10] ss:$8 sps:$4 sm:$0xff]   ;;  %v1573_v7 = vld [vmem:[%s2361_s1 + $0x4] ss:$8 sps:$4 sm:$0xff]   ;;  %vm399_vm0 = vcmask 523264   ;;  %s2312_s7 = scalar_lea.hbm %s2365_s5, %s1489_s30 }
  0x16   : > { %458 = vmatprep.subr.bf16.mxu0 %v1567_v3  ;;  %s1932_s25 = scalar_lea.vmem %s2360_s0, %s1409_s16  ;;  %v1575_v8 = vld [vmem:[%s2361_s1] ss:$8 sps:$4 sm:$0xff]   ;;  %v1592_v11 = vld [vmem:[%s2363_s3 + $0x70] ss:$8 sps:$4 sm:$0xff]   ;;  %v1594_v12 = vld [vmem:[%s2363_s3 + $0x74] ss:$8 sps:$4 sm:$0xff]   ;;  %p1770_p12 = pnand %p1769_p11, %p1902_p5 }
  0x17   : > { %v1576_v9 = vld [vmem:[%s1932_s25] sm:$0xff]   ;;  %v1577_v10 = vld [vmem:[%s1932_s25 + $0x8] sm:$0xff]   ;;  %1490 = vmatprep.subr.bf16.mxu1 %v1594_v12  ;;  %v1600_v15 = vld [vmem:[%s2363_s3 + $0x54] ss:$8 sps:$4 sm:$0xff]   ;;  %v2086_v58 = vshrl.u32 %v269_v57, 7  ;;  %s1774_s13 = scalar_lea.vmem %s1773_s12, 16384 }
  0x18   : > { %v1597_v13 = vld [vmem:[%s2363_s3 + $0x64] ss:$8 sps:$4 sm:$0xff]   ;;  %1506 = vmatpush1.bf16.msra.mxu1 %v1592_v11  ;;  %v1595_v14 = vld [vmem:[%s2363_s3 + $0x60] ss:$8 sps:$4 sm:$0xff]   ;;  %v1578_v16 = vld [vmem:[%s1932_s25 + $0x10] sm:$0xff]   ;;  %p1771_p13 = pneg %p1770_p12  ;;  %p1776_p1 = scmp.lt.s32.totalorder %s1774_s13, %s1768_s22 }
  0x19   : > { %459 = vmatpush1.bf16.msra.mxu0 %v1569_v4  ;;  %1491 = vmatprep.subr.bf16.mxu1 %v1597_v13  ;;  %v1598_v17 = vld [vmem:[%s2363_s3 + $0x50] ss:$8 sps:$4 sm:$0xff]   ;;  %v1603_v18 = vld [vmem:[%s2363_s3 + $0x44] ss:$8 sps:$4 sm:$0xff]   ;;  %v1601_v19 = vld [vmem:[%s2363_s3 + $0x40] ss:$8 sps:$4 sm:$0xff]  }
  0x1a   : > { %460 = vmatprep.subr.bf16.mxu0 %v1570_v5  ;;  %v1606_v20 = vld [vmem:[%s2363_s3 + $0x34] ss:$8 sps:$4 sm:$0xff]   ;;  %v1604_v22 = vld [vmem:[%s2363_s3 + $0x30] ss:$8 sps:$4 sm:$0xff]   ;;  %v1609_v23 = vld [vmem:[%s2363_s3 + $0x24] ss:$8 sps:$4 sm:$0xff]   ;;  %p1777_p2 = por %p1776_p1, %p1775_p0 }
  0x1b   : > { %v1579_v21 = vld [vmem:[%s1932_s25 + $0x18] sm:$0xff]   ;;  %v1607_v24 = vld [vmem:[%s2363_s3 + $0x20] ss:$8 sps:$4 sm:$0xff]   ;;  %v1615_v28 = vld [vmem:[%s2363_s3 + $0x4] ss:$8 sps:$4 sm:$0xff]   ;;  %v275_v59 = vsub.s32 1, %v2086_v58 }
  0x1c   : > { %1507 = vmatpush1.bf16.msra.mxu1 %v1595_v14  ;;  %v1612_v25 = vld [vmem:[%s2363_s3 + $0x14] ss:$8 sps:$4 sm:$0xff]   ;;  %v1580_v26 = vld [vmem:[%s1932_s25 + $0x20] sm:$0xff]   ;;  %v1610_v27 = vld [vmem:[%s2363_s3 + $0x10] ss:$8 sps:$4 sm:$0xff]   ;;  %v271_v60 = vsub.s32 0, %v2086_v58  ;;  %p1778_p3 = pnand %p1777_p2, %p1771_p13 }
  0x1d   : > { %461 = vmatpush1.bf16.msra.mxu0 %v1572_v6  ;;  %1492 = vmatprep.subr.bf16.mxu1 %v1600_v15  ;;  %v1613_v29 = vld [vmem:[%s2363_s3] ss:$8 sps:$4 sm:$0xff]   ;;  %v1618_v30 = vld [vmem:[%s2363_s3 + $0xf4] ss:$8 sps:$4 sm:$0xff]   ;;  %v1616_v32 = vld [vmem:[%s2363_s3 + $0xf0] ss:$8 sps:$4 sm:$0xff]  }
  0x1e   : > { %462 = vmatprep.subr.bf16.mxu0 %v1573_v7  ;;  %v1581_v31 = vld [vmem:[%s1932_s25 + $0x28] sm:$0xff]   ;;  %v1624_v35 = vld [vmem:[%s2363_s3 + $0xd4] ss:$8 sps:$4 sm:$0xff]   ;;  %v1622_v37 = vld [vmem:[%s2363_s3 + $0xd0] ss:$8 sps:$4 sm:$0xff]  }
  0x1f   : > { %v1621_v33 = vld [vmem:[%s2363_s3 + $0xe4] ss:$8 sps:$4 sm:$0xff]   ;;  %v1619_v34 = vld [vmem:[%s2363_s3 + $0xe0] ss:$8 sps:$4 sm:$0xff]   ;;  %v1582_v36 = vld [vmem:[%s1932_s25 + $0x30] sm:$0xff]  }
  0x20   : > { %1508 = vmatpush1.bf16.msra.mxu1 %v1598_v17  ;;  %v1627_v38 = vld [vmem:[%s2363_s3 + $0xc4] ss:$8 sps:$4 sm:$0xff]   ;;  %v1625_v39 = vld [vmem:[%s2363_s3 + $0xc0] ss:$8 sps:$4 sm:$0xff]   ;;  %v1583_v40 = vld [vmem:[%s1932_s25 + $0x38] sm:$0xff]  }
  0x21   : > { %463 = vmatpush1.bf16.msra.mxu0 %v1575_v8  ;;  %1493 = vmatprep.subr.bf16.mxu1 %v1603_v18  ;;  %v1584_v41 = vld [vmem:[%s1932_s25 + $0x40] sm:$0xff]   ;;  %v1630_v42 = vld [vmem:[%s2363_s3 + $0xb4] ss:$8 sps:$4 sm:$0xff]   ;;  %v1628_v43 = vld [vmem:[%s2363_s3 + $0xb0] ss:$8 sps:$4 sm:$0xff]  }
  0x22   : > { %1005 = vmatprep.subr.bf16.mxu0 %v1594_v12  ;;  %v1633_v44 = vld [vmem:[%s2363_s3 + $0xa4] ss:$8 sps:$4 sm:$0xff]   ;;  %v1631_v45 = vld [vmem:[%s2363_s3 + $0xa0] ss:$8 sps:$4 sm:$0xff]   ;;  %v1636_v47 = vld [vmem:[%s2363_s3 + $0x94] ss:$8 sps:$4 sm:$0xff]  }
  0x23   : > { %v1585_v46 = vld [vmem:[%s1932_s25 + $0x48] sm:$0xff]   ;;  %v1634_v48 = vld [vmem:[%s2363_s3 + $0x90] ss:$8 sps:$4 sm:$0xff]   ;;  %v1588_v53 = vld [vmem:[%s1932_s25 + $0x60] sm:$0xff]  }
  0x24   : > { %1434 = vmatmul.mubr.msk.bf16.vlgmr.msra.gmra.mxu0 %vm399_vm0, %v1576_v9  ;;  %1509 = vmatpush1.bf16.msra.mxu1 %v1601_v19  ;;  %v1639_v49 = vld [vmem:[%s2363_s3 + $0x84] ss:$8 sps:$4 sm:$0xff]   ;;  %v1637_v50 = vld [vmem:[%s2363_s3 + $0x80] ss:$8 sps:$4 sm:$0xff]   ;;  %v1586_v51 = vld [vmem:[%s1932_s25 + $0x50] sm:$0xff]  }
  0x25   : > { %490 = vmatprep.mubr.bf16.mxu0 %v1830_v2  ;;  %1006 = vmatpush1.bf16.msra.mxu0 %v1592_v11  ;;  %v1587_v52 = vld [vmem:[%s1932_s25 + $0x58] sm:$0xff]   ;;  %v1589_v54 = vld [vmem:[%s1932_s25 + $0x68] sm:$0xff]   ;;  %v1590_v55 = vld [vmem:[%s1932_s25 + $0x70] sm:$0xff]  }
  0x26   : > { %1007 = vmatprep.subr.bf16.mxu0 %v1597_v13  ;;  %1494 = vmatprep.subr.bf16.mxu1 %v1606_v20  ;;  %v1591_v56 = vld [vmem:[%s1932_s25 + $0x78] sm:$0xff]   ;;  %v267_v61 = vld [vmem:[%s2362_s2] sm:$0x3] }
  0x27   : > { %v2095_v62 = vrot.slane %v267_v61, %v275_v59  ;;  %v2099_v63 = vrot.slane %v267_v61, %v271_v60 }
  0x28   : > { %1510 = vmatpush1.bf16.msra.mxu1 %v1604_v22 }
  0x29   : > { %1008 = vmatpush1.bf16.msra.mxu0 %v1595_v14  ;;  %1495 = vmatprep.subr.bf16.mxu1 %v1609_v23 }
  0x2a   : > { %1009 = vmatprep.subr.bf16.mxu0 %v1600_v15 }
  0x2c   : > { %1435 = vmatmul.mubr.msk.bf16.gmra.mxu0 %vm399_vm0, %v1577_v10  ;;  %1511 = vmatpush1.bf16.msra.mxu1 %v1607_v24 }
  0x2d   : > { %500 = vmatprep.mubr.bf16.mxu0 %v1830_v2  ;;  %1010 = vmatpush1.bf16.msra.mxu0 %v1598_v17 }
  0x2e   : > { %1011 = vmatprep.subr.bf16.mxu0 %v1603_v18  ;;  %1496 = vmatprep.subr.bf16.mxu1 %v1612_v25 }
  0x30   : > { %1512 = vmatpush1.bf16.msra.mxu1 %v1610_v27 }
  0x31   : > { %1012 = vmatpush1.bf16.msra.mxu0 %v1601_v19  ;;  %1497 = vmatprep.subr.bf16.mxu1 %v1615_v28 }
  0x32   : > { %1013 = vmatprep.subr.bf16.mxu0 %v1606_v20 }
  0x34   : > { %1436 = vmatmul.mubr.msk.bf16.gmra.mxu0 %vm399_vm0, %v1578_v16  ;;  %1513 = vmatpush1.bf16.msra.mxu1 %v1613_v29 }
  0x35   : > { %510 = vmatprep.mubr.bf16.mxu0 %v1830_v2  ;;  %1014 = vmatpush1.bf16.msra.mxu0 %v1604_v22 }
  0x36   : > { %1015 = vmatprep.subr.bf16.mxu0 %v1609_v23  ;;  %1498 = vmatprep.subr.bf16.mxu1 %v1618_v30 }
  0x38   : > { %1514 = vmatpush2.bf16.msra.mxu1 %v1616_v32 }
  0x39   : > { %1016 = vmatpush1.bf16.msra.mxu0 %v1607_v24  ;;  %1499 = vmatprep.subr.bf16.mxu1 %v1621_v33 }
  0x3a   : > { %1017 = vmatprep.subr.bf16.mxu0 %v1612_v25 }
  0x3c   : > { %1437 = vmatmul.mubr.msk.bf16.gmra.mxu0 %vm399_vm0, %v1579_v21  ;;  %1515 = vmatpush2.bf16.msra.mxu1 %v1619_v34 }
  0x3d   : > { %520 = vmatprep.mubr.bf16.mxu0 %v1830_v2  ;;  %1018 = vmatpush1.bf16.msra.mxu0 %v1610_v27 }
  0x3e   : > { %1019 = vmatprep.subr.bf16.mxu0 %v1615_v28  ;;  %1500 = vmatprep.subr.bf16.mxu1 %v1624_v35 }
  0x40   : > { %1516 = vmatpush2.bf16.msra.mxu1 %v1622_v37 }
  0x41   : > { %1020 = vmatpush1.bf16.msra.mxu0 %v1613_v29  ;;  %1501 = vmatprep.subr.bf16.mxu1 %v1627_v38 }
  0x42   : > { %1021 = vmatprep.subr.bf16.mxu0 %v1618_v30 }
  0x44   : > { %1438 = vmatmul.mubr.msk.bf16.gmra.mxu0 %vm399_vm0, %v1580_v26  ;;  %1517 = vmatpush2.bf16.msra.mxu1 %v1625_v39 }
  0x45   : > { %530 = vmatprep.mubr.bf16.mxu0 %v1830_v2  ;;  %1022 = vmatpush2.bf16.msra.mxu0 %v1616_v32 }
  0x46   : > { %1023 = vmatprep.subr.bf16.mxu0 %v1621_v33  ;;  %1502 = vmatprep.subr.bf16.mxu1 %v1630_v42 }
  0x48   : > { %1518 = vmatpush2.bf16.msra.mxu1 %v1628_v43 }
  0x49   : > { %1024 = vmatpush2.bf16.msra.mxu0 %v1619_v34  ;;  %1503 = vmatprep.subr.bf16.mxu1 %v1633_v44 }
  0x4a   : > { %1025 = vmatprep.subr.bf16.mxu0 %v1624_v35 }
  0x4c   : > { %1439 = vmatmul.mubr.msk.bf16.gmra.mxu0 %vm399_vm0, %v1581_v31  ;;  %1519 = vmatpush2.bf16.msra.mxu1 %v1631_v45 }
  0x4d   : > { %540 = vmatprep.mubr.bf16.mxu0 %v1830_v2  ;;  %1026 = vmatpush2.bf16.msra.mxu0 %v1622_v37 }
  0x4e   : > { %1027 = vmatprep.subr.bf16.mxu0 %v1627_v38  ;;  %1504 = vmatprep.subr.bf16.mxu1 %v1636_v47 }
  0x50   : > { %1520 = vmatpush2.bf16.msra.mxu1 %v1634_v48 }
  0x51   : > { %1028 = vmatpush2.bf16.msra.mxu0 %v1625_v39  ;;  %1505 = vmatprep.subr.bf16.mxu1 %v1639_v49 }
  0x52   : > { %1029 = vmatprep.subr.bf16.mxu0 %v1630_v42 }
  0x54   : > { %1440 = vmatmul.mubr.msk.bf16.gmra.mxu0 %vm399_vm0, %v1582_v36  ;;  %1521 = vmatpush2.bf16.msra.mxu1 %v1637_v50 }
  0x55   : > { %550 = vmatprep.mubr.bf16.mxu0 %v1830_v2  ;;  %1030 = vmatpush2.bf16.msra.mxu0 %v1628_v43 }
  0x56   : > { %1031 = vmatprep.subr.bf16.mxu0 %v1633_v44 }
  0x59   : > { %1032 = vmatpush2.bf16.msra.mxu0 %v1631_v45 }
  0x5a   : > { %1033 = vmatprep.subr.bf16.mxu0 %v1636_v47 }
  0x5c   : > { %1441 = vmatmul.mubr.msk.bf16.gmra.mxu0 %vm399_vm0, %v1583_v40 }
  0x5d   : > { %560 = vmatprep.mubr.bf16.mxu0 %v1830_v2  ;;  %1034 = vmatpush2.bf16.msra.mxu0 %v1634_v48 }
  0x5e   : > { %1035 = vmatprep.subr.bf16.mxu0 %v1639_v49 }
  0x61   : > { %1036 = vmatpush2.bf16.msra.mxu0 %v1637_v50 }
  0x64   : > { %1442 = vmatmul.mubr.msk.bf16.gmra.mxu0 %vm399_vm0, %v1584_v41 }
  0x65   : > { %570 = vmatprep.mubr.bf16.mxu0 %v1830_v2 }
  0x6c   : > { %1443 = vmatmul.mubr.msk.bf16.gmra.mxu0 %vm399_vm0, %v1585_v46 }
  0x6d   : > { %580 = vmatprep.mubr.bf16.mxu0 %v1830_v2 }
  0x74   : > { %1444 = vmatmul.mubr.msk.bf16.gmra.mxu0 %vm399_vm0, %v1586_v51 }
  0x75   : > { %590 = vmatprep.mubr.bf16.mxu0 %v1830_v2 }
  0x7c   : > { %1445 = vmatmul.mubr.msk.bf16.gmra.mxu0 %vm399_vm0, %v1587_v52 }
  0x7d   : > { %600 = vmatprep.mubr.bf16.mxu0 %v1830_v2 }
  0x84   : > { %1446 = vmatmul.mubr.msk.bf16.gmra.mxu0 %vm399_vm0, %v1588_v53 }
  0x85   : > { %610 = vmatprep.mubr.bf16.mxu0 %v1830_v2 }
  0x8c   : > { %1447 = vmatmul.mubr.msk.bf16.gmra.mxu0 %vm399_vm0, %v1589_v54 }
  0x8d   : > { %620 = vmatprep.mubr.bf16.mxu0 %v1830_v2 }
  0x94   : > { %1448 = vmatmul.mubr.msk.bf16.gmra.mxu0 %vm399_vm0, %v1590_v55 }
  0x95   : > { %630 = vmatprep.mubr.bf16.mxu0 %v1830_v2 }
  0x9c   : > { %1449 = vmatmul.mubr.msk.bf16.gmra.mxu0 %vm399_vm0, %v1591_v56 }
  0xe4   : > { %v482_v0 = vpop.f32.mrf.mxu0 }
  0xe5   : > { %v483_v3 = vadd.f32 %v482_v0, %v2099_v63 }
  0xe6   : > { %v484_v1 = vpop.f32.mrf.mxu0 }
  0xe7   : > { %v485_v2 = vadd.f32 %v484_v1, %v2095_v62  ;;  %v641_v10 = vmul.f32 0.1, %v483_v3 }
  0xe8   : > { %v486_v4 = vpop.f32.mrf.mxu0 }
  0xe9   : > { %v487_v5 = vadd.f32 %v486_v4, %v2099_v63  ;;  %v642_v7 = vmul.f32 0.1, %v485_v2  ;;  %v705_v18 = vmax.f32 %v483_v3, %v641_v10 }
  0xea   : > { %v488_v6 = vpop.f32.mrf.mxu0 }
  0xeb   : > { %v643_v8 = vmul.f32 0.1, %v487_v5  ;;  %v489_v9 = vadd.f32 %v488_v6, %v2095_v62  ;;  %v706_v15 = vmax.f32 %v485_v2, %v642_v7 }
  0xec   : > { %v492_v11 = vpop.f32.mrf.mxu0 }
  0xed   : > { %v644_v12 = vmul.f32 0.1, %v489_v9  ;;  %v707_v13 = vmax.f32 %v487_v5, %v643_v8  ;;  %v493_v19 = vadd.f32 %v492_v11, %v2099_v63 }
  0xee   : > { %v494_v14 = vpop.f32.mrf.mxu0 }
  0xef   : > { %v708_v16 = vmax.f32 %v489_v9, %v644_v12  ;;  %v495_v17 = vadd.f32 %v494_v14, %v2095_v62  ;;  %v769_v23 = vpack.c.bf16 %v707_v13, %v705_v18  ;;  %v645_v28 = vmul.f32 0.1, %v493_v19 }
  0xf0   : > { %v496_v20 = vpop.f32.mrf.mxu0 }
  0xf1   : > { %v497_v21 = vadd.f32 %v496_v20, %v2099_v63  ;;  %v770_v22 = vpack.c.bf16 %v708_v16, %v706_v15  ;;  %v646_v25 = vmul.f32 0.1, %v495_v17  ;;  %v709_v36 = vmax.f32 %v493_v19, %v645_v28 }
  0xf2   : > { %v498_v24 = vpop.f32.mrf.mxu0 }
  0xf3   : > { %v647_v26 = vmul.f32 0.1, %v497_v21  ;;  %v499_v27 = vadd.f32 %v498_v24, %v2095_v62  ;;  %1037 = vmatprep.mubr.bf16.mxu0 %v770_v22  ;;  %v710_v33 = vmax.f32 %v495_v17, %v646_v25 }
  0xf4   : > { %v502_v29 = vpop.f32.mrf.mxu0  ;;  %1038 = vmatmul.mubr.bf16.vlgmr.msra.gmra.mxu0 %v769_v23 }
  0xf5   : > { %v648_v30 = vmul.f32 0.1, %v499_v27  ;;  %v711_v31 = vmax.f32 %v497_v21, %v647_v26  ;;  %v503_v37 = vadd.f32 %v502_v29, %v2099_v63 }
  0xf6   : > { %v504_v32 = vpop.f32.mrf.mxu0 }
  0xf7   : > { %v712_v34 = vmax.f32 %v499_v27, %v648_v30  ;;  %v505_v35 = vadd.f32 %v504_v32, %v2095_v62  ;;  %v771_v42 = vpack.c.bf16 %v711_v31, %v709_v36  ;;  %v649_v46 = vmul.f32 0.1, %v503_v37 }
  0xf8   : > { %v506_v38 = vpop.f32.mrf.mxu0 }
  0xf9   : > { %v507_v39 = vadd.f32 %v506_v38, %v2099_v63  ;;  %v772_v40 = vpack.c.bf16 %v712_v34, %v710_v33  ;;  %v650_v43 = vmul.f32 0.1, %v505_v35  ;;  %v713_v54 = vmax.f32 %v503_v37, %v649_v46 }
  0xfa   : > { %v508_v41 = vpop.f32.mrf.mxu0 }
  0xfb   : > { %v651_v44 = vmul.f32 0.1, %v507_v39  ;;  %v509_v45 = vadd.f32 %v508_v41, %v2095_v62  ;;  %1047 = vmatprep.mubr.bf16.mxu0 %v772_v40  ;;  %v714_v51 = vmax.f32 %v505_v35, %v650_v43 }
  0xfc   : > { %v512_v47 = vpop.f32.mrf.mxu0  ;;  %1048 = vmatmul.mubr.bf16.gmra.mxu0 %v771_v42 }
  0xfd   : > { %v652_v48 = vmul.f32 0.1, %v509_v45  ;;  %v715_v49 = vmax.f32 %v507_v39, %v651_v44  ;;  %v513_v55 = vadd.f32 %v512_v47, %v2099_v63 }
  0xfe   : > { %v514_v50 = vpop.f32.mrf.mxu0 }
  0xff   : > { %v716_v52 = vmax.f32 %v509_v45, %v652_v48  ;;  %v515_v53 = vadd.f32 %v514_v50, %v2095_v62  ;;  %v773_v1 = vpack.c.bf16 %v715_v49, %v713_v54  ;;  %v653_v5 = vmul.f32 0.1, %v513_v55 }
 0x100   : > { %v516_v56 = vpop.f32.mrf.mxu0 }
 0x101   : > { %v517_v57 = vadd.f32 %v516_v56, %v2099_v63  ;;  %v774_v61 = vpack.c.bf16 %v716_v52, %v714_v51  ;;  %v654_v2 = vmul.f32 0.1, %v515_v53  ;;  %v717_v13 = vmax.f32 %v513_v55, %v653_v5 }
 0x102   : > { %v518_v0 = vpop.f32.mrf.mxu0 }
 0x103   : > { %v655_v3 = vmul.f32 0.1, %v517_v57  ;;  %v519_v4 = vadd.f32 %v518_v0, %v2095_v62  ;;  %1057 = vmatprep.mubr.bf16.mxu0 %v774_v61  ;;  %v718_v11 = vmax.f32 %v515_v53, %v654_v2 }
 0x104   : > { %v522_v6 = vpop.f32.mrf.mxu0  ;;  %1058 = vmatmul.mubr.bf16.gmra.mxu0 %v773_v1 }
 0x105   : > { %v656_v7 = vmul.f32 0.1, %v519_v4  ;;  %v719_v8 = vmax.f32 %v517_v57, %v655_v3  ;;  %v523_v14 = vadd.f32 %v522_v6, %v2099_v63 }
 0x106   : > { %v524_v9 = vpop.f32.mrf.mxu0 }
 0x107   : > { %v525_v10 = vadd.f32 %v524_v9, %v2095_v62  ;;  %v720_v12 = vmax.f32 %v519_v4, %v656_v7  ;;  %v775_v19 = vpack.c.bf16 %v719_v8, %v717_v13  ;;  %v657_v23 = vmul.f32 0.1, %v523_v14 }
 0x108   : > { %v526_v15 = vpop.f32.mrf.mxu0 }
 0x109   : > { %v527_v16 = vadd.f32 %v526_v15, %v2099_v63  ;;  %v776_v17 = vpack.c.bf16 %v720_v12, %v718_v11  ;;  %v658_v20 = vmul.f32 0.1, %v525_v10  ;;  %v721_v31 = vmax.f32 %v523_v14, %v657_v23 }
 0x10a   : > { %v528_v18 = vpop.f32.mrf.mxu0 }
 0x10b   : > { %v659_v21 = vmul.f32 0.1, %v527_v16  ;;  %v529_v22 = vadd.f32 %v528_v18, %v2095_v62  ;;  %1067 = vmatprep.mubr.bf16.mxu1 %v776_v17  ;;  %v722_v28 = vmax.f32 %v525_v10, %v658_v20 }
 0x10c   : > { %v532_v24 = vpop.f32.mrf.mxu0  ;;  %1068 = vmatmul.mubr.bf16.vlgmr.msra.gmra.mxu1 %v775_v19 }
 0x10d   : > { %v660_v25 = vmul.f32 0.1, %v529_v22  ;;  %v723_v26 = vmax.f32 %v527_v16, %v659_v21  ;;  %v533_v32 = vadd.f32 %v532_v24, %v2099_v63 }
 0x10e   : > { %v534_v27 = vpop.f32.mrf.mxu0 }
 0x10f   : > { %v724_v29 = vmax.f32 %v529_v22, %v660_v25  ;;  %v535_v30 = vadd.f32 %v534_v27, %v2095_v62  ;;  %v777_v37 = vpack.c.bf16 %v723_v26, %v721_v31  ;;  %v661_v41 = vmul.f32 0.1, %v533_v32 }
 0x110   : > { %v536_v33 = vpop.f32.mrf.mxu0 }
 0x111   : > { %v537_v34 = vadd.f32 %v536_v33, %v2099_v63  ;;  %v778_v35 = vpack.c.bf16 %v724_v29, %v722_v28  ;;  %v662_v38 = vmul.f32 0.1, %v535_v30  ;;  %v725_v49 = vmax.f32 %v533_v32, %v661_v41 }
 0x112   : > { %v538_v36 = vpop.f32.mrf.mxu0 }
 0x113   : > { %v663_v39 = vmul.f32 0.1, %v537_v34  ;;  %v539_v40 = vadd.f32 %v538_v36, %v2095_v62  ;;  %1077 = vmatprep.mubr.bf16.mxu1 %v778_v35  ;;  %v726_v46 = vmax.f32 %v535_v30, %v662_v38 }
 0x114   : > { %v542_v42 = vpop.f32.mrf.mxu0  ;;  %1078 = vmatmul.mubr.bf16.gmra.mxu1 %v777_v37 }
 0x115   : > { %v664_v43 = vmul.f32 0.1, %v539_v40  ;;  %v727_v44 = vmax.f32 %v537_v34, %v663_v39  ;;  %v543_v50 = vadd.f32 %v542_v42, %v2099_v63 }
 0x116   : > { %v544_v45 = vpop.f32.mrf.mxu0 }
 0x117   : > { %v728_v47 = vmax.f32 %v539_v40, %v664_v43  ;;  %v545_v48 = vadd.f32 %v544_v45, %v2095_v62  ;;  %v779_v55 = vpack.c.bf16 %v727_v44, %v725_v49  ;;  %v665_v0 = vmul.f32 0.1, %v543_v50 }
 0x118   : > { %v546_v51 = vpop.f32.mrf.mxu0 }
 0x119   : > { %v547_v52 = vadd.f32 %v546_v51, %v2099_v63  ;;  %v780_v53 = vpack.c.bf16 %v728_v47, %v726_v46  ;;  %v666_v56 = vmul.f32 0.1, %v545_v48  ;;  %v729_v8 = vmax.f32 %v543_v50, %v665_v0 }
 0x11a   : > { %v548_v54 = vpop.f32.mrf.mxu0 }
 0x11b   : > { %v667_v57 = vmul.f32 0.1, %v547_v52  ;;  %v549_v61 = vadd.f32 %v548_v54, %v2095_v62  ;;  %1087 = vmatprep.mubr.bf16.mxu1 %v780_v53  ;;  %v730_v5 = vmax.f32 %v545_v48, %v666_v56 }
 0x11c   : > { %v552_v1 = vpop.f32.mrf.mxu0  ;;  %1088 = vmatmul.mubr.bf16.gmra.mxu1 %v779_v55 }
 0x11d   : > { %v668_v2 = vmul.f32 0.1, %v549_v61  ;;  %v731_v3 = vmax.f32 %v547_v52, %v667_v57  ;;  %v553_v9 = vadd.f32 %v552_v1, %v2099_v63 }
 0x11e   : > { %v554_v4 = vpop.f32.mrf.mxu0 }
 0x11f   : > { %v732_v6 = vmax.f32 %v549_v61, %v668_v2  ;;  %v555_v7 = vadd.f32 %v554_v4, %v2095_v62  ;;  %v781_v14 = vpack.c.bf16 %v731_v3, %v729_v8  ;;  %v669_v18 = vmul.f32 0.1, %v553_v9 }
 0x120   : > { %v556_v10 = vpop.f32.mrf.mxu0 }
 0x121   : > { %v557_v11 = vadd.f32 %v556_v10, %v2099_v63  ;;  %v782_v12 = vpack.c.bf16 %v732_v6, %v730_v5  ;;  %v670_v15 = vmul.f32 0.1, %v555_v7  ;;  %v733_v26 = vmax.f32 %v553_v9, %v669_v18 }
 0x122   : > { %v558_v13 = vpop.f32.mrf.mxu0 }
 0x123   : > { %v671_v16 = vmul.f32 0.1, %v557_v11  ;;  %v559_v17 = vadd.f32 %v558_v13, %v2095_v62  ;;  %1097 = vmatprep.mubr.bf16.mxu1 %v782_v12  ;;  %v734_v23 = vmax.f32 %v555_v7, %v670_v15 }
 0x124   : > { %v562_v19 = vpop.f32.mrf.mxu0  ;;  %1098 = vmatmul.mubr.bf16.gmra.mxu1 %v781_v14 }
 0x125   : > { %v672_v20 = vmul.f32 0.1, %v559_v17  ;;  %v735_v21 = vmax.f32 %v557_v11, %v671_v16  ;;  %v563_v27 = vadd.f32 %v562_v19, %v2099_v63 }
 0x126   : > { %v564_v22 = vpop.f32.mrf.mxu0 }
 0x127   : > { %v736_v24 = vmax.f32 %v559_v17, %v672_v20  ;;  %v565_v25 = vadd.f32 %v564_v22, %v2095_v62  ;;  %v783_v32 = vpack.c.bf16 %v735_v21, %v733_v26  ;;  %v673_v36 = vmul.f32 0.1, %v563_v27 }
 0x128   : > { %v566_v28 = vpop.f32.mrf.mxu0 }
 0x129   : > { %v567_v29 = vadd.f32 %v566_v28, %v2099_v63  ;;  %v784_v30 = vpack.c.bf16 %v736_v24, %v734_v23  ;;  %v674_v33 = vmul.f32 0.1, %v565_v25  ;;  %v737_v44 = vmax.f32 %v563_v27, %v673_v36 }
 0x12a   : > { %v568_v31 = vpop.f32.mrf.mxu0 }
 0x12b   : > { %v675_v34 = vmul.f32 0.1, %v567_v29  ;;  %v569_v35 = vadd.f32 %v568_v31, %v2095_v62  ;;  %1107 = vmatprep.mubr.bf16.mxu1 %v784_v30  ;;  %v738_v41 = vmax.f32 %v565_v25, %v674_v33 }
 0x12c   : > { %v572_v37 = vpop.f32.mrf.mxu0  ;;  %1108 = vmatmul.mubr.bf16.gmra.mxu1 %v783_v32 }
 0x12d   : > { %v676_v38 = vmul.f32 0.1, %v569_v35  ;;  %v739_v39 = vmax.f32 %v567_v29, %v675_v34  ;;  %v573_v45 = vadd.f32 %v572_v37, %v2099_v63 }
 0x12e   : > { %v574_v40 = vpop.f32.mrf.mxu0 }
 0x12f   : > { %v740_v42 = vmax.f32 %v569_v35, %v676_v38  ;;  %v575_v43 = vadd.f32 %v574_v40, %v2095_v62  ;;  %v785_v50 = vpack.c.bf16 %v739_v39, %v737_v44  ;;  %v677_v54 = vmul.f32 0.1, %v573_v45 }
 0x130   : > { %v576_v46 = vpop.f32.mrf.mxu0 }
 0x131   : > { %v577_v47 = vadd.f32 %v576_v46, %v2099_v63  ;;  %v786_v48 = vpack.c.bf16 %v740_v42, %v738_v41  ;;  %v678_v51 = vmul.f32 0.1, %v575_v43  ;;  %v741_v3 = vmax.f32 %v573_v45, %v677_v54 }
 0x132   : > { %v578_v49 = vpop.f32.mrf.mxu0 }
 0x133   : > { %v679_v52 = vmul.f32 0.1, %v577_v47  ;;  %v579_v53 = vadd.f32 %v578_v49, %v2095_v62  ;;  %1117 = vmatprep.mubr.bf16.mxu1 %v786_v48  ;;  %v742_v0 = vmax.f32 %v575_v43, %v678_v51 }
 0x134   : > { %v582_v55 = vpop.f32.mrf.mxu0  ;;  %1118 = vmatmul.mubr.bf16.gmra.mxu1 %v785_v50 }
 0x135   : > { %v680_v56 = vmul.f32 0.1, %v579_v53  ;;  %v743_v57 = vmax.f32 %v577_v47, %v679_v52  ;;  %v583_v4 = vadd.f32 %v582_v55, %v2099_v63 }
 0x136   : > { %v584_v61 = vpop.f32.mrf.mxu0 }
 0x137   : > { %v744_v1 = vmax.f32 %v579_v53, %v680_v56  ;;  %v585_v2 = vadd.f32 %v584_v61, %v2095_v62  ;;  %v787_v9 = vpack.c.bf16 %v743_v57, %v741_v3  ;;  %v681_v13 = vmul.f32 0.1, %v583_v4 }
 0x138   : > { %v586_v5 = vpop.f32.mrf.mxu0 }
 0x139   : > { %v587_v6 = vadd.f32 %v586_v5, %v2099_v63  ;;  %v788_v7 = vpack.c.bf16 %v744_v1, %v742_v0  ;;  %v682_v10 = vmul.f32 0.1, %v585_v2  ;;  %v745_v21 = vmax.f32 %v583_v4, %v681_v13 }
 0x13a   : > { %v588_v8 = vpop.f32.mrf.mxu0 }
 0x13b   : > { %v683_v11 = vmul.f32 0.1, %v587_v6  ;;  %v589_v12 = vadd.f32 %v588_v8, %v2095_v62  ;;  %1127 = vmatprep.mubr.bf16.mxu1 %v788_v7  ;;  %v746_v18 = vmax.f32 %v585_v2, %v682_v10 }
 0x13c   : > { %v592_v14 = vpop.f32.mrf.mxu0  ;;  %1128 = vmatmul.mubr.bf16.gmra.mxu1 %v787_v9 }
 0x13d   : > { %v684_v15 = vmul.f32 0.1, %v589_v12  ;;  %v747_v16 = vmax.f32 %v587_v6, %v683_v11  ;;  %v593_v22 = vadd.f32 %v592_v14, %v2099_v63 }
 0x13e   : > { %v594_v17 = vpop.f32.mrf.mxu0 }
 0x13f   : > { %v748_v19 = vmax.f32 %v589_v12, %v684_v15  ;;  %v595_v20 = vadd.f32 %v594_v17, %v2095_v62  ;;  %v789_v27 = vpack.c.bf16 %v747_v16, %v745_v21  ;;  %v685_v31 = vmul.f32 0.1, %v593_v22 }
 0x140   : > { %v596_v23 = vpop.f32.mrf.mxu0 }
 0x141   : > { %v597_v24 = vadd.f32 %v596_v23, %v2099_v63  ;;  %v790_v25 = vpack.c.bf16 %v748_v19, %v746_v18  ;;  %v686_v28 = vmul.f32 0.1, %v595_v20  ;;  %v749_v39 = vmax.f32 %v593_v22, %v685_v31 }
 0x142   : > { %v598_v26 = vpop.f32.mrf.mxu0 }
 0x143   : > { %v687_v29 = vmul.f32 0.1, %v597_v24  ;;  %v599_v30 = vadd.f32 %v598_v26, %v2095_v62  ;;  %1137 = vmatprep.mubr.bf16.mxu1 %v790_v25  ;;  %v750_v36 = vmax.f32 %v595_v20, %v686_v28 }
 0x144   : > { %v602_v32 = vpop.f32.mrf.mxu0  ;;  %1138 = vmatmul.mubr.bf16.gmra.mxu1 %v789_v27 }
 0x145   : > { %v688_v33 = vmul.f32 0.1, %v599_v30  ;;  %v751_v34 = vmax.f32 %v597_v24, %v687_v29  ;;  %v603_v40 = vadd.f32 %v602_v32, %v2099_v63 }
 0x146   : > { %v604_v35 = vpop.f32.mrf.mxu0 }
 0x147   : > { %v752_v37 = vmax.f32 %v599_v30, %v688_v33  ;;  %v605_v38 = vadd.f32 %v604_v35, %v2095_v62  ;;  %v791_v45 = vpack.c.bf16 %v751_v34, %v749_v39  ;;  %v689_v49 = vmul.f32 0.1, %v603_v40 }
 0x148   : > { %v606_v41 = vpop.f32.mrf.mxu0 }
 0x149   : > { %v607_v42 = vadd.f32 %v606_v41, %v2099_v63  ;;  %v792_v43 = vpack.c.bf16 %v752_v37, %v750_v36  ;;  %v690_v46 = vmul.f32 0.1, %v605_v38  ;;  %v753_v57 = vmax.f32 %v603_v40, %v689_v49 }
 0x14a   : > { %v608_v44 = vpop.f32.mrf.mxu0 }
 0x14b   : > { %v691_v47 = vmul.f32 0.1, %v607_v42  ;;  %v609_v48 = vadd.f32 %v608_v44, %v2095_v62  ;;  %1147 = vmatprep.mubr.bf16.mxu1 %v792_v43  ;;  %v754_v54 = vmax.f32 %v605_v38, %v690_v46 }
 0x14c   : > { %v612_v50 = vpop.f32.mrf.mxu0  ;;  %1148 = vmatmul.mubr.bf16.gmra.mxu1 %v791_v45 }
 0x14d   : > { %v692_v51 = vmul.f32 0.1, %v609_v48  ;;  %v755_v52 = vmax.f32 %v607_v42, %v691_v47  ;;  %v613_v61 = vadd.f32 %v612_v50, %v2099_v63 }
 0x14e   : > { %v614_v53 = vpop.f32.mrf.mxu0 }
 0x14f   : > { %v756_v55 = vmax.f32 %v609_v48, %v692_v51  ;;  %v615_v56 = vadd.f32 %v614_v53, %v2095_v62  ;;  %v793_v4 = vpack.c.bf16 %v755_v52, %v753_v57  ;;  %v693_v8 = vmul.f32 0.1, %v613_v61 }
 0x150   : > { %v616_v0 = vpop.f32.mrf.mxu0 }
 0x151   : > { %v617_v1 = vadd.f32 %v616_v0, %v2099_v63  ;;  %v794_v2 = vpack.c.bf16 %v756_v55, %v754_v54  ;;  %v694_v5 = vmul.f32 0.1, %v615_v56  ;;  %v757_v16 = vmax.f32 %v613_v61, %v693_v8 }
 0x152   : > { %v618_v3 = vpop.f32.mrf.mxu0 }
 0x153   : > { %v695_v6 = vmul.f32 0.1, %v617_v1  ;;  %v619_v7 = vadd.f32 %v618_v3, %v2095_v62  ;;  %1157 = vmatprep.mubr.bf16.mxu1 %v794_v2  ;;  %v758_v13 = vmax.f32 %v615_v56, %v694_v5 }
 0x154   : > { %v622_v9 = vpop.f32.mrf.mxu0  ;;  %1158 = vmatmul.mubr.bf16.gmra.mxu1 %v793_v4 }
 0x155   : > { %v696_v10 = vmul.f32 0.1, %v619_v7  ;;  %v759_v11 = vmax.f32 %v617_v1, %v695_v6  ;;  %v623_v17 = vadd.f32 %v622_v9, %v2099_v63 }
 0x156   : > { %v624_v12 = vpop.f32.mrf.mxu0 }
 0x157   : > { %v760_v14 = vmax.f32 %v619_v7, %v696_v10  ;;  %v625_v15 = vadd.f32 %v624_v12, %v2095_v62  ;;  %v795_v22 = vpack.c.bf16 %v759_v11, %v757_v16  ;;  %v697_v26 = vmul.f32 0.1, %v623_v17 }
 0x158   : > { %v626_v18 = vpop.f32.mrf.mxu0 }
 0x159   : > { %v627_v19 = vadd.f32 %v626_v18, %v2099_v63  ;;  %v796_v20 = vpack.c.bf16 %v760_v14, %v758_v13  ;;  %v698_v23 = vmul.f32 0.1, %v625_v15  ;;  %v761_v34 = vmax.f32 %v623_v17, %v697_v26 }
 0x15a   : > { %v628_v21 = vpop.f32.mrf.mxu0 }
 0x15b   : > { %v699_v24 = vmul.f32 0.1, %v627_v19  ;;  %v629_v25 = vadd.f32 %v628_v21, %v2095_v62  ;;  %1167 = vmatprep.mubr.bf16.mxu1 %v796_v20  ;;  %v762_v31 = vmax.f32 %v625_v15, %v698_v23 }
 0x15c   : > { %v632_v27 = vpop.f32.mrf.mxu0  ;;  %1168 = vmatmul.mubr.bf16.gmra.mxu1 %v795_v22 }
 0x15d   : > { %v700_v28 = vmul.f32 0.1, %v629_v25  ;;  %v763_v29 = vmax.f32 %v627_v19, %v699_v24  ;;  %v633_v35 = vadd.f32 %v632_v27, %v2099_v63 }
 0x15e   : > { %v634_v30 = vpop.f32.mrf.mxu0 }
 0x15f   : > { %v764_v32 = vmax.f32 %v629_v25, %v700_v28  ;;  %v635_v33 = vadd.f32 %v634_v30, %v2095_v62  ;;  %v797_v40 = vpack.c.bf16 %v763_v29, %v761_v34  ;;  %v701_v44 = vmul.f32 0.1, %v633_v35 }
 0x160   : > { %v636_v36 = vpop.f32.mrf.mxu0 }
 0x161   : > { %v637_v37 = vadd.f32 %v636_v36, %v2099_v63  ;;  %v798_v38 = vpack.c.bf16 %v764_v32, %v762_v31  ;;  %v702_v41 = vmul.f32 0.1, %v635_v33  ;;  %v765_v49 = vmax.f32 %v633_v35, %v701_v44  ;;  %v833_v63 = vld [vmem:[%s2364_s4] sm:$0x3] }
 0x162   : > { %v638_v39 = vpop.f32.mrf.mxu0  ;;  %v2174_v52 = vrot.slane %v833_v63, %v275_v59 }
 0x163   : > { %v703_v42 = vmul.f32 0.1, %v637_v37  ;;  %v639_v43 = vadd.f32 %v638_v39, %v2095_v62  ;;  %1177 = vmatprep.mubr.bf16.mxu1 %v798_v38  ;;  %v766_v47 = vmax.f32 %v635_v33, %v702_v41  ;;  %v2170_v62 = vrot.slane %v833_v63, %v271_v60 }
 0x164   : > { %1178 = vmatmul.mubr.bf16.gmra.mxu1 %v797_v40 }
 0x165   : > { %v704_v45 = vmul.f32 0.1, %v639_v43  ;;  %v767_v46 = vmax.f32 %v637_v37, %v703_v42 }
 0x167   : > { %v768_v48 = vmax.f32 %v639_v43, %v704_v45  ;;  %v799_v51 = vpack.c.bf16 %v767_v46, %v765_v49 }
 0x169   : > { %v800_v50 = vpack.c.bf16 %v768_v48, %v766_v47 }
 0x16b   : > { %1187 = vmatprep.mubr.bf16.mxu1 %v800_v50 }
 0x16c   : > { %1188 = vmatmul.mubr.bf16.gmra.mxu1 %v799_v51 }
 0x1b4   : > { %v1039_v53 = vpop.f32.mrf.mxu0 }
 0x1b5   : > { %v1040_v54 = vadd.f32 %v1039_v53, %v2170_v62 }
 0x1b6   : > { %v1041_v55 = vpop.f32.mrf.mxu0 }
 0x1b7   : > { %1640 = vtanh.f32 %v1040_v54  ;;  %v1042_v56 = vadd.f32 %v1041_v55, %v2174_v52 }
 0x1b8   : > { %v1043_v57 = vpop.f32.mrf.mxu0 }
 0x1b9   : > { %1642 = vtanh.f32 %v1042_v56  ;;  %v1044_v61 = vadd.f32 %v1043_v57, %v2170_v62 }
 0x1ba   : > { %v1045_v0 = vpop.f32.mrf.mxu0 }
 0x1bb   : > { %1644 = vtanh.f32 %v1044_v61  ;;  %v1046_v60 = vadd.f32 %v1045_v0, %v2174_v52 }
 0x1bc   : > { %v1049_v58 = vpop.f32.mrf.mxu0 }
 0x1bd   : > { %1646 = vtanh.f32 %v1046_v60  ;;  %v1050_v59 = vadd.f32 %v1049_v58, %v2170_v62 }
 0x1be   : > { %v1051_v1 = vpop.f32.mrf.mxu0 }
 0x1bf   : > { %1648 = vtanh.f32 %v1050_v59  ;;  %v1052_v2 = vadd.f32 %v1051_v1, %v2174_v52 }
 0x1c0   : > { %v1053_v3 = vpop.f32.mrf.mxu0 }
 0x1c1   : > { %1650 = vtanh.f32 %v1052_v2  ;;  %v1054_v4 = vadd.f32 %v1053_v3, %v2170_v62 }
 0x1c2   : > { %v1055_v5 = vpop.f32.mrf.mxu0 }
 0x1c3   : > { %1652 = vtanh.f32 %v1054_v4  ;;  %v1056_v6 = vadd.f32 %v1055_v5, %v2174_v52 }
 0x1c4   : > { %v1641_v7 = vpop.eup %1640  ;;  %v1059_v8 = vpop.f32.mrf.mxu0 }
 0x1c5   : > { %1262 = vst [vmem:[%s2187_s26] sm:$0xff] %v1641_v7  ;;  %1654 = vtanh.f32 %v1056_v6  ;;  %v1060_v9 = vadd.f32 %v1059_v8, %v2170_v62 }
 0x1c6   : > { %v1643_v10 = vpop.eup %1642  ;;  %v1061_v11 = vpop.f32.mrf.mxu0 }
 0x1c7   : > { %1263 = vst [vmem:[%s2187_s26 + $0x8] sm:$0xff] %v1643_v10  ;;  %1656 = vtanh.f32 %v1060_v9  ;;  %v1062_v12 = vadd.f32 %v1061_v11, %v2174_v52 }
 0x1c8   : > { %v1645_v13 = vpop.eup %1644  ;;  %v1063_v14 = vpop.f32.mrf.mxu0 }
 0x1c9   : > { %1264 = vst [vmem:[%s2187_s26 + $0x10] sm:$0xff] %v1645_v13  ;;  %1658 = vtanh.f32 %v1062_v12  ;;  %v1064_v15 = vadd.f32 %v1063_v14, %v2170_v62 }
 0x1ca   : > { %v1647_v16 = vpop.eup %1646  ;;  %v1065_v17 = vpop.f32.mrf.mxu0 }
 0x1cb   : > { %1265 = vst [vmem:[%s2187_s26 + $0x18] sm:$0xff] %v1647_v16  ;;  %1660 = vtanh.f32 %v1064_v15  ;;  %v1066_v18 = vadd.f32 %v1065_v17, %v2174_v52 }
 0x1cc   : > { %v1649_v19 = vpop.eup %1648  ;;  %v1069_v20 = vpop.f32.mrf.mxu1 }
 0x1cd   : > { %1266 = vst [vmem:[%s2187_s26 + $0x20] sm:$0xff] %v1649_v19  ;;  %1662 = vtanh.f32 %v1066_v18  ;;  %v1070_v21 = vadd.f32 %v1069_v20, %v2170_v62 }
 0x1ce   : > { %v1651_v22 = vpop.eup %1650  ;;  %v1071_v23 = vpop.f32.mrf.mxu1 }
 0x1cf   : > { %1267 = vst [vmem:[%s2187_s26 + $0x28] sm:$0xff] %v1651_v22  ;;  %1664 = vtanh.f32 %v1070_v21  ;;  %v1072_v24 = vadd.f32 %v1071_v23, %v2174_v52 }
 0x1d0   : > { %v1653_v25 = vpop.eup %1652  ;;  %v1073_v26 = vpop.f32.mrf.mxu1 }
 0x1d1   : > { %1268 = vst [vmem:[%s2187_s26 + $0x30] sm:$0xff] %v1653_v25  ;;  %1666 = vtanh.f32 %v1072_v24  ;;  %v1074_v27 = vadd.f32 %v1073_v26, %v2170_v62 }
 0x1d2   : > { %v1655_v28 = vpop.eup %1654  ;;  %v1075_v29 = vpop.f32.mrf.mxu1 }
 0x1d3   : > { %1269 = vst [vmem:[%s2187_s26 + $0x38] sm:$0xff] %v1655_v28  ;;  %1668 = vtanh.f32 %v1074_v27  ;;  %v1076_v30 = vadd.f32 %v1075_v29, %v2174_v52 }
 0x1d4   : > { %v1657_v31 = vpop.eup %1656  ;;  %v1079_v32 = vpop.f32.mrf.mxu1 }
 0x1d5   : > { %1270 = vst [vmem:[%s2187_s26 + $0x40] sm:$0xff] %v1657_v31  ;;  %1670 = vtanh.f32 %v1076_v30  ;;  %v1080_v33 = vadd.f32 %v1079_v32, %v2170_v62 }
 0x1d6   : > { %v1659_v34 = vpop.eup %1658  ;;  %v1081_v35 = vpop.f32.mrf.mxu1 }
 0x1d7   : > { %1271 = vst [vmem:[%s2187_s26 + $0x48] sm:$0xff] %v1659_v34  ;;  %1672 = vtanh.f32 %v1080_v33  ;;  %v1082_v36 = vadd.f32 %v1081_v35, %v2174_v52 }
 0x1d8   : > { %v1661_v37 = vpop.eup %1660  ;;  %v1083_v38 = vpop.f32.mrf.mxu1 }
 0x1d9   : > { %1272 = vst [vmem:[%s2187_s26 + $0x50] sm:$0xff] %v1661_v37  ;;  %1674 = vtanh.f32 %v1082_v36  ;;  %v1084_v39 = vadd.f32 %v1083_v38, %v2170_v62 }
 0x1da   : > { %v1663_v40 = vpop.eup %1662  ;;  %v1085_v41 = vpop.f32.mrf.mxu1 }
 0x1db   : > { %1273 = vst [vmem:[%s2187_s26 + $0x58] sm:$0xff] %v1663_v40  ;;  %1676 = vtanh.f32 %v1084_v39  ;;  %v1086_v42 = vadd.f32 %v1085_v41, %v2174_v52 }
 0x1dc   : > { %v1665_v43 = vpop.eup %1664  ;;  %v1089_v44 = vpop.f32.mrf.mxu1 }
 0x1dd   : > { %1274 = vst [vmem:[%s2187_s26 + $0x60] sm:$0xff] %v1665_v43  ;;  %1678 = vtanh.f32 %v1086_v42  ;;  %v1090_v45 = vadd.f32 %v1089_v44, %v2170_v62 }
 0x1de   : > { %v1667_v46 = vpop.eup %1666  ;;  %v1091_v47 = vpop.f32.mrf.mxu1 }
 0x1df   : > { %1275 = vst [vmem:[%s2187_s26 + $0x68] sm:$0xff] %v1667_v46  ;;  %1680 = vtanh.f32 %v1090_v45  ;;  %v1092_v48 = vadd.f32 %v1091_v47, %v2174_v52 }
 0x1e0   : > { %v1669_v49 = vpop.eup %1668  ;;  %v1093_v50 = vpop.f32.mrf.mxu1 }
 0x1e1   : > { %1276 = vst [vmem:[%s2187_s26 + $0x70] sm:$0xff] %v1669_v49  ;;  %1682 = vtanh.f32 %v1092_v48  ;;  %v1094_v51 = vadd.f32 %v1093_v50, %v2170_v62 }
 0x1e2   : > { %v1671_v63 = vpop.eup %1670  ;;  %v1095_v53 = vpop.f32.mrf.mxu1 }
 0x1e3   : > { %1277 = vst [vmem:[%s2187_s26 + $0x78] sm:$0xff] %v1671_v63  ;;  %1684 = vtanh.f32 %v1094_v51  ;;  %v1096_v54 = vadd.f32 %v1095_v53, %v2174_v52 }
 0x1e4   : > { %v1673_v55 = vpop.eup %1672  ;;  %v1099_v56 = vpop.f32.mrf.mxu1 }
 0x1e5   : > { %1278 = vst [vmem:[%s2187_s26 + $0x80] sm:$0xff] %v1673_v55  ;;  %1686 = vtanh.f32 %v1096_v54  ;;  %v1100_v57 = vadd.f32 %v1099_v56, %v2170_v62 }
 0x1e6   : > { %v1675_v61 = vpop.eup %1674  ;;  %v1101_v0 = vpop.f32.mrf.mxu1 }
 0x1e7   : > { %1279 = vst [vmem:[%s2187_s26 + $0x88] sm:$0xff] %v1675_v61  ;;  %1688 = vtanh.f32 %v1100_v57  ;;  %v1102_v60 = vadd.f32 %v1101_v0, %v2174_v52 }
 0x1e8   : > { %v1677_v58 = vpop.eup %1676  ;;  %v1103_v59 = vpop.f32.mrf.mxu1 }
 0x1e9   : > { %1280 = vst [vmem:[%s2187_s26 + $0x90] sm:$0xff] %v1677_v58  ;;  %1690 = vtanh.f32 %v1102_v60  ;;  %v1104_v1 = vadd.f32 %v1103_v59, %v2170_v62 }
 0x1ea   : > { %v1679_v2 = vpop.eup %1678  ;;  %v1105_v3 = vpop.f32.mrf.mxu1 }
 0x1eb   : > { %1281 = vst [vmem:[%s2187_s26 + $0x98] sm:$0xff] %v1679_v2  ;;  %1692 = vtanh.f32 %v1104_v1  ;;  %v1106_v4 = vadd.f32 %v1105_v3, %v2174_v52 }
 0x1ec   : > { %v1681_v5 = vpop.eup %1680  ;;  %v1109_v6 = vpop.f32.mrf.mxu1 }
 0x1ed   : > { %1282 = vst [vmem:[%s2187_s26 + $0xa0] sm:$0xff] %v1681_v5  ;;  %1694 = vtanh.f32 %v1106_v4  ;;  %v1110_v7 = vadd.f32 %v1109_v6, %v2170_v62 }
 0x1ee   : > { %v1683_v8 = vpop.eup %1682  ;;  %v1111_v9 = vpop.f32.mrf.mxu1 }
 0x1ef   : > { %1283 = vst [vmem:[%s2187_s26 + $0xa8] sm:$0xff] %v1683_v8  ;;  %1696 = vtanh.f32 %v1110_v7  ;;  %v1112_v10 = vadd.f32 %v1111_v9, %v2174_v52 }
 0x1f0   : > { %v1685_v11 = vpop.eup %1684  ;;  %v1113_v12 = vpop.f32.mrf.mxu1 }
 0x1f1   : > { %1284 = vst [vmem:[%s2187_s26 + $0xb0] sm:$0xff] %v1685_v11  ;;  %1698 = vtanh.f32 %v1112_v10  ;;  %v1114_v13 = vadd.f32 %v1113_v12, %v2170_v62 }
 0x1f2   : > { %v1687_v14 = vpop.eup %1686  ;;  %v1115_v15 = vpop.f32.mrf.mxu1 }
 0x1f3   : > { %1285 = vst [vmem:[%s2187_s26 + $0xb8] sm:$0xff] %v1687_v14  ;;  %1700 = vtanh.f32 %v1114_v13  ;;  %v1116_v16 = vadd.f32 %v1115_v15, %v2174_v52 }
 0x1f4   : > { %v1689_v17 = vpop.eup %1688  ;;  %v1119_v18 = vpop.f32.mrf.mxu1 }
 0x1f5   : > { %1286 = vst [vmem:[%s2187_s26 + $0xc0] sm:$0xff] %v1689_v17  ;;  %1702 = vtanh.f32 %v1116_v16  ;;  %v1120_v19 = vadd.f32 %v1119_v18, %v2170_v62 }
 0x1f6   : > { %v1691_v20 = vpop.eup %1690  ;;  %v1121_v21 = vpop.f32.mrf.mxu1 }
 0x1f7   : > { %1287 = vst [vmem:[%s2187_s26 + $0xc8] sm:$0xff] %v1691_v20  ;;  %1704 = vtanh.f32 %v1120_v19  ;;  %v1122_v22 = vadd.f32 %v1121_v21, %v2174_v52 }
 0x1f8   : > { %v1693_v23 = vpop.eup %1692  ;;  %v1123_v24 = vpop.f32.mrf.mxu1 }
 0x1f9   : > { %1288 = vst [vmem:[%s2187_s26 + $0xd0] sm:$0xff] %v1693_v23  ;;  %1706 = vtanh.f32 %v1122_v22  ;;  %v1124_v25 = vadd.f32 %v1123_v24, %v2170_v62 }
 0x1fa   : > { %v1695_v26 = vpop.eup %1694  ;;  %v1125_v27 = vpop.f32.mrf.mxu1 }
 0x1fb   : > { %1289 = vst [vmem:[%s2187_s26 + $0xd8] sm:$0xff] %v1695_v26  ;;  %1708 = vtanh.f32 %v1124_v25  ;;  %v1126_v28 = vadd.f32 %v1125_v27, %v2174_v52 }
 0x1fc   : > { %v1697_v29 = vpop.eup %1696  ;;  %v1129_v30 = vpop.f32.mrf.mxu1 }
 0x1fd   : > { %1290 = vst [vmem:[%s2187_s26 + $0xe0] sm:$0xff] %v1697_v29  ;;  %1710 = vtanh.f32 %v1126_v28  ;;  %v1130_v31 = vadd.f32 %v1129_v30, %v2170_v62 }
 0x1fe   : > { %v1699_v32 = vpop.eup %1698  ;;  %v1131_v33 = vpop.f32.mrf.mxu1 }
 0x1ff   : > { %1291 = vst [vmem:[%s2187_s26 + $0xe8] sm:$0xff] %v1699_v32  ;;  %1712 = vtanh.f32 %v1130_v31  ;;  %v1132_v34 = vadd.f32 %v1131_v33, %v2174_v52 }
 0x200   : > { %v1701_v35 = vpop.eup %1700  ;;  %v1133_v36 = vpop.f32.mrf.mxu1 }
 0x201   : > { %1292 = vst [vmem:[%s2187_s26 + $0xf0] sm:$0xff] %v1701_v35  ;;  %1714 = vtanh.f32 %v1132_v34  ;;  %v1134_v37 = vadd.f32 %v1133_v36, %v2170_v62 }
 0x202   : > { %v1703_v38 = vpop.eup %1702  ;;  %v1135_v39 = vpop.f32.mrf.mxu1 }
 0x203   : > { %1293 = vst [vmem:[%s2187_s26 + $0xf8] sm:$0xff] %v1703_v38  ;;  %1716 = vtanh.f32 %v1134_v37  ;;  %v1136_v40 = vadd.f32 %v1135_v39, %v2174_v52 }
 0x204   : > { %v1705_v41 = vpop.eup %1704  ;;  %v1139_v42 = vpop.f32.mrf.mxu1 }
 0x205   : > { %1294 = vst [vmem:[%s2187_s26 + $0x100] sm:$0xff] %v1705_v41  ;;  %1718 = vtanh.f32 %v1136_v40  ;;  %v1140_v43 = vadd.f32 %v1139_v42, %v2170_v62 }
 0x206   : > { %v1707_v44 = vpop.eup %1706  ;;  %v1141_v45 = vpop.f32.mrf.mxu1 }
 0x207   : > { %1295 = vst [vmem:[%s2187_s26 + $0x108] sm:$0xff] %v1707_v44  ;;  %1720 = vtanh.f32 %v1140_v43  ;;  %v1142_v46 = vadd.f32 %v1141_v45, %v2174_v52 }
 0x208   : > { %v1709_v47 = vpop.eup %1708  ;;  %v1143_v48 = vpop.f32.mrf.mxu1 }
 0x209   : > { %1296 = vst [vmem:[%s2187_s26 + $0x110] sm:$0xff] %v1709_v47  ;;  %1722 = vtanh.f32 %v1142_v46  ;;  %v1144_v49 = vadd.f32 %v1143_v48, %v2170_v62 }
 0x20a   : > { %v1711_v50 = vpop.eup %1710  ;;  %v1145_v51 = vpop.f32.mrf.mxu1 }
 0x20b   : > { %1297 = vst [vmem:[%s2187_s26 + $0x118] sm:$0xff] %v1711_v50  ;;  %1724 = vtanh.f32 %v1144_v49  ;;  %v1146_v63 = vadd.f32 %v1145_v51, %v2174_v52 }
 0x20c   : > { %v1713_v53 = vpop.eup %1712  ;;  %v1149_v54 = vpop.f32.mrf.mxu1 }
 0x20d   : > { %1298 = vst [vmem:[%s2187_s26 + $0x120] sm:$0xff] %v1713_v53  ;;  %1726 = vtanh.f32 %v1146_v63  ;;  %v1150_v55 = vadd.f32 %v1149_v54, %v2170_v62 }
 0x20e   : > { %v1715_v56 = vpop.eup %1714  ;;  %v1151_v57 = vpop.f32.mrf.mxu1 }
 0x20f   : > { %1299 = vst [vmem:[%s2187_s26 + $0x128] sm:$0xff] %v1715_v56  ;;  %1728 = vtanh.f32 %v1150_v55  ;;  %v1152_v61 = vadd.f32 %v1151_v57, %v2174_v52 }
 0x210   : > { %v1717_v0 = vpop.eup %1716  ;;  %v1153_v60 = vpop.f32.mrf.mxu1 }
 0x211   : > { %1300 = vst [vmem:[%s2187_s26 + $0x130] sm:$0xff] %v1717_v0  ;;  %1730 = vtanh.f32 %v1152_v61  ;;  %v1154_v58 = vadd.f32 %v1153_v60, %v2170_v62 }
 0x212   : > { %v1719_v59 = vpop.eup %1718  ;;  %v1155_v1 = vpop.f32.mrf.mxu1 }
 0x213   : > { %1301 = vst [vmem:[%s2187_s26 + $0x138] sm:$0xff] %v1719_v59  ;;  %1732 = vtanh.f32 %v1154_v58  ;;  %v1156_v2 = vadd.f32 %v1155_v1, %v2174_v52 }
 0x214   : > { %v1721_v3 = vpop.eup %1720  ;;  %v1159_v4 = vpop.f32.mrf.mxu1 }
 0x215   : > { %1302 = vst [vmem:[%s2187_s26 + $0x140] sm:$0xff] %v1721_v3  ;;  %1734 = vtanh.f32 %v1156_v2  ;;  %v1160_v5 = vadd.f32 %v1159_v4, %v2170_v62 }
 0x216   : > { %v1723_v6 = vpop.eup %1722  ;;  %v1161_v7 = vpop.f32.mrf.mxu1 }
 0x217   : > { %1303 = vst [vmem:[%s2187_s26 + $0x148] sm:$0xff] %v1723_v6  ;;  %1736 = vtanh.f32 %v1160_v5  ;;  %v1162_v8 = vadd.f32 %v1161_v7, %v2174_v52 }
 0x218   : > { %v1725_v9 = vpop.eup %1724  ;;  %v1163_v10 = vpop.f32.mrf.mxu1 }
 0x219   : > { %1304 = vst [vmem:[%s2187_s26 + $0x150] sm:$0xff] %v1725_v9  ;;  %1738 = vtanh.f32 %v1162_v8  ;;  %v1164_v11 = vadd.f32 %v1163_v10, %v2170_v62 }
 0x21a   : > { %v1727_v12 = vpop.eup %1726  ;;  %v1165_v13 = vpop.f32.mrf.mxu1 }
 0x21b   : > { %1305 = vst [vmem:[%s2187_s26 + $0x158] sm:$0xff] %v1727_v12  ;;  %1740 = vtanh.f32 %v1164_v11  ;;  %v1166_v14 = vadd.f32 %v1165_v13, %v2174_v52 }
 0x21c   : > { %v1729_v15 = vpop.eup %1728  ;;  %v1169_v16 = vpop.f32.mrf.mxu1 }
 0x21d   : > { %1306 = vst [vmem:[%s2187_s26 + $0x160] sm:$0xff] %v1729_v15  ;;  %1742 = vtanh.f32 %v1166_v14  ;;  %v1170_v17 = vadd.f32 %v1169_v16, %v2170_v62 }
 0x21e   : > { %v1731_v18 = vpop.eup %1730  ;;  %v1171_v19 = vpop.f32.mrf.mxu1 }
 0x21f   : > { %1307 = vst [vmem:[%s2187_s26 + $0x168] sm:$0xff] %v1731_v18  ;;  %1744 = vtanh.f32 %v1170_v17  ;;  %v1172_v20 = vadd.f32 %v1171_v19, %v2174_v52 }
 0x220   : > { %v1733_v21 = vpop.eup %1732  ;;  %v1173_v22 = vpop.f32.mrf.mxu1 }
 0x221   : > { %1308 = vst [vmem:[%s2187_s26 + $0x170] sm:$0xff] %v1733_v21  ;;  %1746 = vtanh.f32 %v1172_v20  ;;  %v1174_v23 = vadd.f32 %v1173_v22, %v2170_v62 }
 0x222   : > { %v1735_v24 = vpop.eup %1734  ;;  %v1175_v25 = vpop.f32.mrf.mxu1 }
 0x223   : > { %1309 = vst [vmem:[%s2187_s26 + $0x178] sm:$0xff] %v1735_v24  ;;  %1748 = vtanh.f32 %v1174_v23  ;;  %v1176_v26 = vadd.f32 %v1175_v25, %v2174_v52 }
 0x224   : > { %v1737_v27 = vpop.eup %1736  ;;  %v1179_v28 = vpop.f32.mrf.mxu1 }
 0x225   : > { %1310 = vst [vmem:[%s2187_s26 + $0x180] sm:$0xff] %v1737_v27  ;;  %1750 = vtanh.f32 %v1176_v26  ;;  %v1180_v29 = vadd.f32 %v1179_v28, %v2170_v62 }
 0x226   : > { %v1739_v30 = vpop.eup %1738  ;;  %v1181_v31 = vpop.f32.mrf.mxu1 }
 0x227   : > { %1311 = vst [vmem:[%s2187_s26 + $0x188] sm:$0xff] %v1739_v30  ;;  %1752 = vtanh.f32 %v1180_v29  ;;  %v1182_v32 = vadd.f32 %v1181_v31, %v2174_v52 }
 0x228   : > { %v1741_v33 = vpop.eup %1740  ;;  %v1183_v34 = vpop.f32.mrf.mxu1 }
 0x229   : > { %1312 = vst [vmem:[%s2187_s26 + $0x190] sm:$0xff] %v1741_v33  ;;  %1754 = vtanh.f32 %v1182_v32  ;;  %v1184_v35 = vadd.f32 %v1183_v34, %v2170_v62 }
 0x22a   : > { %v1743_v36 = vpop.eup %1742  ;;  %v1185_v37 = vpop.f32.mrf.mxu1 }
 0x22b   : > { %1313 = vst [vmem:[%s2187_s26 + $0x198] sm:$0xff] %v1743_v36  ;;  %1756 = vtanh.f32 %v1184_v35  ;;  %v1186_v38 = vadd.f32 %v1185_v37, %v2174_v52 }
 0x22c   : > { %v1745_v39 = vpop.eup %1744  ;;  %v1189_v40 = vpop.f32.mrf.mxu1 }
 0x22d   : > { %1314 = vst [vmem:[%s2187_s26 + $0x1a0] sm:$0xff] %v1745_v39  ;;  %1758 = vtanh.f32 %v1186_v38  ;;  %v1190_v41 = vadd.f32 %v1189_v40, %v2170_v62 }
 0x22e   : > { %v1747_v42 = vpop.eup %1746  ;;  %v1191_v43 = vpop.f32.mrf.mxu1 }
 0x22f   : > { %1315 = vst [vmem:[%s2187_s26 + $0x1a8] sm:$0xff] %v1747_v42  ;;  %1760 = vtanh.f32 %v1190_v41  ;;  %v1192_v44 = vadd.f32 %v1191_v43, %v2174_v52 }
 0x230   : > { %v1749_v45 = vpop.eup %1748  ;;  %v1193_v46 = vpop.f32.mrf.mxu1 }
 0x231   : > { %1316 = vst [vmem:[%s2187_s26 + $0x1b0] sm:$0xff] %v1749_v45  ;;  %1762 = vtanh.f32 %v1192_v44  ;;  %v1194_v47 = vadd.f32 %v1193_v46, %v2170_v62 }
 0x232   : > { %v1751_v48 = vpop.eup %1750  ;;  %v1195_v49 = vpop.f32.mrf.mxu1 }
 0x233   : > { %1317 = vst [vmem:[%s2187_s26 + $0x1b8] sm:$0xff] %v1751_v48  ;;  %1764 = vtanh.f32 %v1194_v47  ;;  %v1196_v50 = vadd.f32 %v1195_v49, %v2174_v52 }
 0x234   : > { %v1753_v51 = vpop.eup %1752 }
 0x235   : > { %1318 = vst [vmem:[%s2187_s26 + $0x1c0] sm:$0xff] %v1753_v51  ;;  %1766 = vtanh.f32 %v1196_v50 }
 0x236   : > { %v1755_v63 = vpop.eup %1754 }
 0x237   : > { %1319 = vst [vmem:[%s2187_s26 + $0x1c8] sm:$0xff] %v1755_v63 }
 0x238   : > { %v1757_v53 = vpop.eup %1756 }
 0x239   : > { %1320 = vst [vmem:[%s2187_s26 + $0x1d0] sm:$0xff] %v1757_v53 }
 0x23a   : > { %v1759_v62 = vpop.eup %1758 }
 0x23b   : > { %1321 = vst [vmem:[%s2187_s26 + $0x1d8] sm:$0xff] %v1759_v62 }
 0x23c   : > { %v1761_v54 = vpop.eup %1760 }
 0x23d   : > { %1322 = vst [vmem:[%s2187_s26 + $0x1e0] sm:$0xff] %v1761_v54 }
 0x23e   : > { %v1763_v55 = vpop.eup %1762 }
 0x23f   : > { %1323 = vst [vmem:[%s2187_s26 + $0x1e8] sm:$0xff] %v1763_v55 }
 0x240   : > { %v1765_v52 = vpop.eup %1764 }
 0x241   : > { %1324 = vst [vmem:[%s2187_s26 + $0x1f0] sm:$0xff] %v1765_v52 }
 0x242   : > { %v1767_v56 = vpop.eup %1766 }
 0x243   : > { %1325 = vst [vmem:[%s2187_s26 + $0x1f8] sm:$0xff] %v1767_v56 }
 0x244   : > { %1781 = shalt.err (!%p1778_p3)
}
 0x245   : > { %s1782_s14 = scalar_lea.hbm %s2312_s7, 8192  ;;  %s1786_s16 = scalar_lea.hbm %s2365_s5, 16384 }
 0x246   : > { %p1783_p4 = scmp.ne.s32.totalorder %s2312_s7, %s1782_s14  ;;  %p1787_p9 = scmp.lt.s32.totalorder %s2312_s7, %s2365_s5 }
 0x247   : > { %p1788_p10 = scmp.lt.s32.totalorder %s1786_s16, %s1782_s14 }
 0x248   : > { %p1784_p7 = pnand %p1783_p4, %p1902_p5 }
 0x249   : > { %p1789_p11 = por %p1788_p10, %p1787_p9 }
 0x24a   : > { %p1785_p8 = pneg %p1784_p7 }
 0x24c   : > { %p1790_p12 = pnand %p1789_p11, %p1785_p8 }
 0x24e   : > { %1793 = shalt.err (!%p1790_p12)
}
 0x24f   : > { %s1832_s26 = smov 256   ;;  %s1833_s30 = smov 16  }
 0x250   : > { %1522 = dma.vmem_to_hbm [thread:$0]  (%p1902_p5), %s2314_s6, 8192, %s2312_s7, %s2320_s10, %s1832_s26, %s1832_s26, %s1833_s30  }
 0x251 PF: > { %p1528_p13 = scmp.ge.s32.totalorder %s1828_s21, 2  ;;  %s1356_s8 = sand.u32 1, %s1816_s18  }
 0x252   : > { %s1357_s9 = scalar_lea.sflag [#allocation3], %s1356_s8 }
 0x253   : > { %p1525_p0 = pnand %p1528_p13, %p1906_p6 }
 0x255   : > { %p1526_p1 = pneg %p1525_p0 }
 0x257   : > { %1811 = dma.done.wait (%p1526_p1), %s1357_s9, 8192  }
 0x258   : > { %1813 = vsyncadd (%p1526_p1), %s1357_s9, 4294959104  ;;  %p15_p2 = scmp.ge.s32.totalorder %s1889_s24, 4   ;;  %s2368_s18 = smov %s1820_s19 }
 0x259   : > { %s2369_s19 = smov %s1824_s20  ;;  %s2370_s20 = smov %s1900_s27 }
 0x25a   : > { %s2371_s21 = smov %s1889_s24  ;;  %17 = sbr.rel (!%p15_p2) target bundleno = 3 (0x3), region = 75 }
 0x25f   :  { %1362 = vsyncpa [#allocation3], 1 }
 0x260   :  { %1364 = vsyncpa [#allocation3 + $0x1], 1 }

</bundles_post_ra>
